<compile_context>
chip_gen: v7x
topology: tpu7x:2x2x1
jax: 0.10.0
libtpu: 0.0.40
codegen_flags: <defaults>
</compile_context>

<pallas_src>
import functools

import jax
import jax.numpy as jnp
from jax.experimental import pallas as pl
from jax.experimental.pallas import tpu as pltpu


def gru_cell_kernel(x_ref, h_ref, wx_ref, wh_ref, b_ref, o_ref, *, nhid):
    x = x_ref[...]                      # [bm, nobs]  f32
    h = h_ref[...]                      # [bm, nhid]  f32

    # Single lane-dense fused matmul: [bm, 4*nhid] pre-activations for
    # (r, z, xn, hn).  bf16 operands on the MXU, f32 accumulation.
    gates = (
        jnp.dot(x.astype(wx_ref.dtype), wx_ref[...],
                preferred_element_type=jnp.float32)
        + jnp.dot(h.astype(wh_ref.dtype), wh_ref[...],
                  preferred_element_type=jnp.float32)
        + b_ref[...]                    # packed [1, 4*nhid] bias, f32
    )

    # Split gate columns in-register (static lane slices).
    r = jax.nn.sigmoid(gates[:, 0 * nhid:1 * nhid])
    z = jax.nn.sigmoid(gates[:, 1 * nhid:2 * nhid])
    xn = gates[:, 2 * nhid:3 * nhid]    # x@Wxn + bxn
    hn = gates[:, 3 * nhid:4 * nhid]    # h@Whn + bhn
    n = jnp.tanh(xn + r * hn)

    # (1 - z) * n + z * h  ==  n + z * (h - n)
    o_ref[...] = (n + z * (h - n)).astype(o_ref.dtype)


def gru_cell_pallas(x, h, params, *, bm=8):
    """x: [B, nobs] f32, h: [B, nhid] f32; params from init_params()[0]."""
    B, nobs = x.shape
    _, nhid = h.shape
    wx, wh, b = params["wx_big"], params["wh_big"], params["b_big"]
    assert wx.shape == (nobs, 4 * nhid)
    assert wh.shape == (nhid, 4 * nhid)

    if B % bm != 0:       # keep the demo simple: fall back to one batch block
        bm = B
    grid = (B // bm,)

    kernel = functools.partial(gru_cell_kernel, nhid=nhid)
    return pl.pallas_call(
        kernel,
        out_shape=jax.ShapeDtypeStruct((B, nhid), x.dtype),
        grid_spec=pltpu.PrefetchScalarGridSpec(
            num_scalar_prefetch=0,
            grid=grid,
            in_specs=[
                pl.BlockSpec((bm, nobs), lambda i: (i, 0)),          # x tile
                pl.BlockSpec((bm, nhid), lambda i: (i, 0)),          # h tile
                pl.BlockSpec((nobs, 4 * nhid), lambda i: (0, 0)),    # Wx_big
                pl.BlockSpec((nhid, 4 * nhid), lambda i: (0, 0)),    # Wh_big
                pl.BlockSpec((1, 4 * nhid), lambda i: (0, 0)),       # bias row
            ],
            out_specs=pl.BlockSpec((bm, nhid), lambda i: (i, 0)),
        ),
        compiler_params=pltpu.CompilerParams(
            dimension_semantics=("parallel",),
        ),
    )(x, h, wx, wh, b)


def init_params(key, nobs, nhid, matmul_dtype=jnp.bfloat16):
    """Torch-Linear-style init; returns (packed kernel params, raw f32 params)."""
    ks = jax.random.split(key, 8)

    def linear(kw, kb, fan_in, fan_out):
        bound = 1.0 / float(fan_in) ** 0.5
        w = jax.random.uniform(kw, (fan_out, fan_in), jnp.float32, -bound, bound)
        b = jax.random.uniform(kb, (fan_out,), jnp.float32, -bound, bound)
        return w.T, b                                 # [fan_in, fan_out], [fan_out]

    wr_t, br = linear(ks[0], ks[1], nobs + nhid, nhid)    # i2r
    wz_t, bz = linear(ks[2], ks[3], nobs + nhid, nhid)    # i2z
    wxn_t, bxn = linear(ks[4], ks[5], nobs, nhid)         # x2n
    whn_t, bhn = linear(ks[6], ks[7], nhid, nhid)         # h2n

    # Stack gates along N (lane-dense 4*nhid columns) and split the concat
    # dimension into x-rows / h-rows so no host-side concat is needed.
    # Column order: [ r | z | xn | hn ].
    zx = jnp.zeros((nobs, nhid), jnp.float32)
    zh = jnp.zeros((nhid, nhid), jnp.float32)
    wx_big = jnp.concatenate([wr_t[:nobs], wz_t[:nobs], wxn_t, zx], axis=1)
    wh_big = jnp.concatenate([wr_t[nobs:], wz_t[nobs:], zh, whn_t], axis=1)
    b_big = jnp.concatenate([br, bz, bxn, bhn]).reshape(1, 4 * nhid)

    packed = dict(
        wx_big=wx_big.astype(matmul_dtype),   # [nobs, 4*nhid] bf16
        wh_big=wh_big.astype(matmul_dtype),   # [nhid, 4*nhid] bf16
        b_big=b_big.astype(jnp.float32),      # [1, 4*nhid]    f32
    )
    raw = dict(wr_t=wr_t, br=br, wz_t=wz_t, bz=bz,
               wxn_t=wxn_t, bxn=bxn, whn_t=whn_t, bhn=bhn)
    return packed, raw


def gru_cell_ref(x, h, raw, matmul_dtype=jnp.bfloat16):
    """Pure-JAX reference in the original PyTorch formulation.

    Matmul operands are rounded to the same dtype the kernel feeds the MXU so
    the comparison only measures kernel correctness, not bf16 rounding."""
    rnd = lambda a: a.astype(matmul_dtype).astype(jnp.float32)
    xb, hb = rnd(x), rnd(h)
    comb = jnp.concatenate([xb, hb], axis=1)
    r = jax.nn.sigmoid(comb @ rnd(raw["wr_t"]) + raw["br"])
    z = jax.nn.sigmoid(comb @ rnd(raw["wz_t"]) + raw["bz"])
    n = jnp.tanh((xb @ rnd(raw["wxn_t"]) + raw["bxn"])
                 + r * (hb @ rnd(raw["whn_t"]) + raw["bhn"]))
    return (1.0 - z) * n + z * h


if __name__ == "__main__":
    B, nobs, nhid = 16, 16, 32          # 4*nhid = 128 -> lane-dense fused matmul
    key = jax.random.PRNGKey(0)
    kx, kh, kp = jax.random.split(key, 3)
    x = jax.random.normal(kx, (B, nobs), jnp.float32)
    h = jax.random.normal(kh, (B, nhid), jnp.float32)
    params, raw = init_params(kp, nobs, nhid)

    out = gru_cell_pallas(x, h, params, bm=8)
    out = jax.block_until_ready(out)

    ref = gru_cell_ref(x, h, raw)
    assert out.shape == (B, nhid)
    assert jnp.allclose(out, ref, atol=1e-3, rtol=1e-3), "mismatch vs reference"
    print("KERNEL_OK")
</pallas_src>

<mosaic_0001>
module attributes {stable_mosaic.version = 11 : i64} {
  func.func @gru_cell_kernel(%arg0: i32, %arg1: memref<8x16xf32, #tpu.memory_space<vmem>>, %arg2: memref<8x32xf32, #tpu.memory_space<vmem>>, %arg3: memref<16x128xbf16, #tpu.memory_space<vmem>>, %arg4: memref<32x128xbf16, #tpu.memory_space<vmem>>, %arg5: memref<1x128xf32, #tpu.memory_space<vmem>>, %arg6: memref<8x32xf32, #tpu.memory_space<vmem>>) attributes {dimension_semantics = [#tpu.dimension_semantics<parallel>], iteration_bounds = array<i64: 2>, scalar_prefetch = 0 : i64, scratch_operands = 0 : i64, tpu.core_type = #tpu.core_type<tc>, window_params = [{transform_indices = @transform_0, window_bounds = array<i64: 8, 16>}, {transform_indices = @transform_1, window_bounds = array<i64: 8, 32>}, {pipeline_mode = #tpu.pipeline_mode<synchronous>, transform_indices = @transform_2, window_bounds = array<i64: 16, 128>}, {pipeline_mode = #tpu.pipeline_mode<synchronous>, transform_indices = @transform_3, window_bounds = array<i64: 32, 128>}, {pipeline_mode = #tpu.pipeline_mode<synchronous>, transform_indices = @transform_4, window_bounds = array<i64: 1, 128>}, {transform_indices = @transform_5, window_bounds = array<i64: 8, 32>}]} {
    %c0 = arith.constant 0 : index
    %c0_0 = arith.constant 0 : index
    %0 = vector.load %arg1[%c0, %c0_0] : memref<8x16xf32, #tpu.memory_space<vmem>>, vector<8x16xf32>
    %c0_1 = arith.constant 0 : index
    %c0_2 = arith.constant 0 : index
    %1 = vector.load %arg2[%c0_1, %c0_2] : memref<8x32xf32, #tpu.memory_space<vmem>>, vector<8x32xf32>
    %2 = arith.truncf %0 : vector<8x16xf32> to vector<8x16xbf16>
    %c0_3 = arith.constant 0 : index
    %c0_4 = arith.constant 0 : index
    %3 = vector.load %arg3[%c0_3, %c0_4] : memref<16x128xbf16, #tpu.memory_space<vmem>>, vector<16x128xbf16>
    %cst = arith.constant dense<0.000000e+00> : vector<8x128xf32>
    %4 = tpu.matmul %2, %3, %cst {dimension_numbers = #tpu.dot_dimension_numbers<[1], [0], [0], [1], [0, 0, 1, 1], [], []>} : vector<8x16xbf16>, vector<16x128xbf16>, vector<8x128xf32> -> vector<8x128xf32>
    %5 = arith.truncf %1 : vector<8x32xf32> to vector<8x32xbf16>
    %c0_5 = arith.constant 0 : index
    %c0_6 = arith.constant 0 : index
    %6 = vector.load %arg4[%c0_5, %c0_6] : memref<32x128xbf16, #tpu.memory_space<vmem>>, vector<32x128xbf16>
    %cst_7 = arith.constant dense<0.000000e+00> : vector<8x128xf32>
    %7 = tpu.matmul %5, %6, %cst_7 {dimension_numbers = #tpu.dot_dimension_numbers<[1], [0], [0], [1], [0, 0, 1, 1], [], []>} : vector<8x32xbf16>, vector<32x128xbf16>, vector<8x128xf32> -> vector<8x128xf32>
    %8 = arith.addf %4, %7 : vector<8x128xf32>
    %c0_8 = arith.constant 0 : index
    %c0_9 = arith.constant 0 : index
    %9 = vector.load %arg5[%c0_8, %c0_9] : memref<1x128xf32, #tpu.memory_space<vmem>>, vector<1x128xf32>
    %10 = vector.broadcast %9 : vector<1x128xf32> to vector<8x128xf32>
    %11 = arith.addf %8, %10 : vector<8x128xf32>
    %12 = vector.extract_strided_slice %11 {offsets = [0, 0], sizes = [8, 32], strides = [1, 1]} : vector<8x128xf32> to vector<8x32xf32>
    %13 = arith.negf %12 : vector<8x32xf32>
    %14 = math.exp %13 : vector<8x32xf32>
    %cst_10 = arith.constant 1.000000e+00 : f32
    %15 = vector.broadcast %cst_10 : f32 to vector<8x32xf32>
    %16 = arith.addf %15, %14 : vector<8x32xf32>
    %17 = arith.divf %15, %16 : vector<8x32xf32>
    %18 = vector.extract_strided_slice %11 {offsets = [0, 32], sizes = [8, 32], strides = [1, 1]} : vector<8x128xf32> to vector<8x32xf32>
    %19 = arith.negf %18 : vector<8x32xf32>
    %20 = math.exp %19 : vector<8x32xf32>
    %cst_11 = arith.constant 1.000000e+00 : f32
    %21 = vector.broadcast %cst_11 : f32 to vector<8x32xf32>
    %22 = arith.addf %21, %20 : vector<8x32xf32>
    %23 = arith.divf %21, %22 : vector<8x32xf32>
    %24 = vector.extract_strided_slice %11 {offsets = [0, 64], sizes = [8, 32], strides = [1, 1]} : vector<8x128xf32> to vector<8x32xf32>
    %25 = vector.extract_strided_slice %11 {offsets = [0, 96], sizes = [8, 32], strides = [1, 1]} : vector<8x128xf32> to vector<8x32xf32>
    %26 = arith.mulf %17, %25 : vector<8x32xf32>
    %27 = arith.addf %24, %26 : vector<8x32xf32>
    %28 = math.tanh %27 : vector<8x32xf32>
    %29 = arith.subf %1, %28 : vector<8x32xf32>
    %30 = arith.mulf %23, %29 : vector<8x32xf32>
    %31 = arith.addf %28, %30 : vector<8x32xf32>
    %c0_12 = arith.constant 0 : index
    %c0_13 = arith.constant 0 : index
    %32 = vector.load %arg6[%c0_12, %c0_13] : memref<8x32xf32, #tpu.memory_space<vmem>>, vector<8x32xf32>
    tpu.vector_store %arg6[%c0_12, %c0_13], %31 {strides = array<i32>} : memref<8x32xf32, #tpu.memory_space<vmem>>, vector<8x32xf32>,
    return
  }
  func.func @transform_0(%arg0: i32) -> (i32, i32) {
    %c0_i32 = arith.constant 0 : i32
    %c0_i32_0 = arith.constant 0 : i32
    return %arg0, %c0_i32 : i32, i32
  }
  func.func @transform_1(%arg0: i32) -> (i32, i32) {
    %c0_i32 = arith.constant 0 : i32
    %c0_i32_0 = arith.constant 0 : i32
    return %arg0, %c0_i32 : i32, i32
  }
  func.func @transform_2(%arg0: i32) -> (i32, i32) {
    %c0_i32 = arith.constant 0 : i32
    %c0_i32_0 = arith.constant 0 : i32
    %c0_i32_1 = arith.constant 0 : i32
    return %c0_i32, %c0_i32_0 : i32, i32
  }
  func.func @transform_3(%arg0: i32) -> (i32, i32) {
    %c0_i32 = arith.constant 0 : i32
    %c0_i32_0 = arith.constant 0 : i32
    %c0_i32_1 = arith.constant 0 : i32
    return %c0_i32, %c0_i32_0 : i32, i32
  }
  func.func @transform_4(%arg0: i32) -> (i32, i32) {
    %c0_i32 = arith.constant 0 : i32
    %c0_i32_0 = arith.constant 0 : i32
    %c0_i32_1 = arith.constant 0 : i32
    return %c0_i32, %c0_i32_0 : i32, i32
  }
  func.func @transform_5(%arg0: i32) -> (i32, i32) {
    %c0_i32 = arith.constant 0 : i32
    %c0_i32_0 = arith.constant 0 : i32
    return %arg0, %c0_i32 : i32, i32
  }
}

</mosaic_0001>

<bundles_post_ra>
// kernel: tpu_custom_call.1
= control target key start
LH: loop header
LB: loop body
LE: loop exit
PB: predicated region body
PF: predicated region fallthrough
CT: control target
= control target key end

     0   :  { %s1242_s0 = inlined_call_operand.hbm [shape: f32[16,16], index: 0, kind: input, shape index: {}]   ;;  %s1243_s1 = inlined_call_operand.hbm [shape: f32[16,32], index: 1, kind: input, shape index: {}]   ;;  %s1244_s2 = inlined_call_operand.hbm [shape: bf16[16,128], index: 2, kind: input, shape index: {}]   ;;  %s1245_s3 = inlined_call_operand.hbm [shape: bf16[32,128], index: 3, kind: input, shape index: {}]   ;;  %s1246_s4 = inlined_call_operand.vmem [shape: f32[1,128], index: 4, kind: input, shape index: {}]   ;;  %s1247_s5 = inlined_call_operand.hbm [shape: f32[16,32], index: 5, kind: output, shape index: {}]  }
   0x1   :  { %1252 = sst [smem:[#allocation16_spill]] %s1244_s2 }
   0x2   :  { %1253 = sst [smem:[#allocation17_spill]] %s1245_s3 }
   0x3   :  { %10 = vsyncpa [#allocation3], 0 }
   0x4   :  { %12 = vsyncpa [#allocation3 + $0x1], 0 }
   0x5   :  { %13 = vsyncpa [#allocation6], 0 }
   0x6   :  { %15 = vsyncpa [#allocation6 + $0x1], 0 }
   0x7   :  { %16 = vsyncpa [#allocation9], 0 }
   0x8   :  { %17 = vsyncpa [#allocation4], 0 }
   0x9   :  { %19 = vsyncpa [#allocation4 + $0x1], 0  ;;  %s963_s18 = smov 0   ;;  %s965_s19 = smov 0  }
   0xa   :  { %s967_s20 = smov 0   ;;  %s969_s21 = smov 0  }
   0xb LB: > { %s984_s22 = sadd.s32 4294967295, %s920_s21   ;;  %s594_s23 = sadd.s32 4294967294, %s920_s21   ;;  %s920_s21 = sphi %s969_s21, %s1275_s21   ;;  %s916_s20 = sphi %s967_s20, %s1274_s20   ;;  %s912_s19 = sphi %s965_s19, %s1273_s19   ;;  %s908_s18 = sphi %s963_s18, %s1272_s18  }
   0xc   : > { %p45_p0 = scmp.ne.s32.totalorder %s912_s19, %s908_s18  ;;  %p1248_p1 = scmp.eq.s32.totalorder %s984_s22, 0 }
   0xd   : > { %p164_p3 = scmp.eq.s32.totalorder %s594_s23, 1  ;;  %p595_p5 = scmp.ge.s32.totalorder %s920_s21, 1 }
   0xe   : > { %p993_p4 = por %p1248_p1, %p45_p0  ;;  %p171_p7 = scmp.lt.s32.totalorder %s920_s21, 3 }
   0xf   : > { %p998_p6 = por %p164_p3, %p45_p0  ;;  %s922_s27 = smov [#allocation7]  }
  0x10   : > { %s1254_s24 = scalar_select %p993_p4, 1, 0 }
  0x11   : > { %s1255_s25 = scalar_select %p998_p6, 1, 0 }
  0x12   : > { %p1003_p8 = pnand %p595_p5, %p171_p7  ;;  %s183_s28 = sshll.u32 %s922_s27, 4  ;;  %s1007_s28 = int_to_ptr.vmem [resolvable:$true] %s183_s28 }
  0x13   : > { %s923_s30 = smov [#allocation8]   ;;  %s1258_s2 = sld [smem:[#allocation16_spill]] }
  0x14   : > { %s1256_s26 = scalar_select %p1003_p8, 1, 0 }
  0x15   : > { %p653_p9 = pneg %p1003_p8  ;;  %s196_s6 = sshll.u32 %s923_s30, 4  ;;  %s1018_s6 = int_to_ptr.vmem [resolvable:$true] %s196_s6 }
  0x17   : > { %p1014_p11 = pnand %p653_p9, %p1248_p1 }
  0x19   : > { %s726_s9 = scalar_lea.hbm %s1258_s2, 128  ;;  %p728_p13 = pneg %p1014_p11 }
  0x1a   : > { %p727_p12 = scmp.ne.s32.totalorder %s1258_s2, %s726_s9  ;;  %p733_p5 = scmp.lt.u32.totalorder %s726_s9, %s1258_s2 }
  0x1c   : > { %p729_p0 = pnand %p728_p13, %p727_p12 }
  0x1e   : > { %p730_p3 = pneg %p729_p0 }
  0x20   : > { %p735_p7 = pnand %p733_p5, %p730_p3 }
  0x22   : > { %738 = shalt.err (!%p735_p7)
}
  0x23   : > { %s739_s14 = scalar_lea.vmem %s1007_s28, 128  ;;  %p747_p2 = scmp.lt.s32.totalorder %s1007_s28, %s1007_s28 }
  0x24   : > { %p740_p9 = scmp.ne.s32.totalorder %s1007_s28, %s739_s14  ;;  %p748_p12 = scmp.lt.s32.totalorder %s739_s14, %s739_s14 }
  0x26   : > { %p742_p10 = pnand %p740_p9, %p728_p13  ;;  %p749_p0 = por %p748_p12, %p747_p2 }
  0x28   : > { %p743_p1 = pneg %p742_p10 }
  0x2a   : > { %p750_p6 = pnand %p749_p0, %p743_p1 }
  0x2c   : > { %753 = shalt.err (!%p750_p6)
}
  0x2d   : > { %s924_s15 = smov 64   ;;  %s925_s16 = smov 4  }
  0x2e   : > { %656 = dma.hbm_to_vmem [thread:$0]  (!%p1014_p11), %s1258_s2, 128, %s1007_s28, [#allocation6], %s924_s15, %s924_s15, %s925_s16  }
  0x2f   : > { %s1259_s3 = sld [smem:[#allocation17_spill]] }
  0x35   : > { %s754_s7 = scalar_lea.hbm %s1259_s3, 256 }
  0x36   : > { %p755_p2 = scmp.ne.s32.totalorder %s1259_s3, %s754_s7  ;;  %p761_p10 = scmp.lt.u32.totalorder %s754_s7, %s1259_s3 }
  0x38   : > { %p757_p1 = pnand %p755_p2, %p728_p13 }
  0x3a   : > { %p758_p6 = pneg %p757_p1 }
  0x3c   : > { %p763_p3 = pnand %p761_p10, %p758_p6 }
  0x3e   : > { %766 = shalt.err (!%p763_p3)
}
  0x3f   : > { %s767_s28 = scalar_lea.vmem %s1018_s6, 256  ;;  %p775_p12 = scmp.lt.s32.totalorder %s1018_s6, %s1018_s6 }
  0x40   : > { %p768_p5 = scmp.ne.s32.totalorder %s1018_s6, %s767_s28  ;;  %p776_p0 = scmp.lt.s32.totalorder %s767_s28, %s767_s28 }
  0x42   : > { %p770_p7 = pnand %p768_p5, %p728_p13  ;;  %p777_p2 = por %p776_p0, %p775_p12 }
  0x44   : > { %p771_p9 = pneg %p770_p7 }
  0x46   : > { %p778_p1 = pnand %p777_p2, %p771_p9 }
  0x48   : > { %781 = shalt.err (!%p778_p1)
}
  0x49   : > { %659 = dma.hbm_to_vmem [thread:$0]  (!%p1014_p11), %s1259_s3, 256, %s1018_s6, [#allocation9], %s924_s15, %s924_s15, %s925_s16  }
  0x4a   : > { %s1073_s14 = sadd.s32 1, %s920_s21   ;;  %s32_s29 = sadd.s32 1, %s916_s20 }
  0x4b   : > { %s29_s17 = ssub.s32 %s920_s21, %s1073_s14  ;;  %p39_p13 = scmp.ne.s32.totalorder %s916_s20, %s912_s19 }
  0x4c   : > { %p30_p6 = scmp.eq.s32.totalorder %s29_s17, 0  ;;  %p40_p10 = scmp.eq.s32.totalorder %s920_s21, 0 }
  0x4d   : > { %p1260_p3 = scmp.eq.s32.totalorder %s984_s22, 1  ;;  %p673_p7 = scmp.lt.s32.totalorder %s920_s21, 2 }
  0x4e   : > { %s1089_s27 = scalar_select %p30_p6, %s916_s20, %s32_s29  }
  0x4f   : > { %p1083_p5 = por %p1260_p3, %p39_p13  ;;  %p41_p9 = por %p40_p10, %p39_p13 }
  0x50   : > { %s213_s30 = sand.u32 1, %s916_s20   ;;  %s600_s15 = sshll.u32 %s920_s21, 7 }
  0x51   : > { %s1261_s23 = scalar_select %p1083_p5, 1, 0 }
  0x52   : > { %s1092_s6 = sshll.u32 %s213_s30, 3  ;;  %s1098_s8 = scalar_lea.hbm %s1242_s0, %s600_s15 }
  0x53   : > { %s217_s9 = scalar_lea.vmem [#allocation2], %s1092_s6  ;;  %p1103_p11 = pnand %p673_p7, %p41_p9 }
  0x54   : > { %s224_s10 = sshll.u32 %s217_s9, 4  ;;  %s1110_s13 = scalar_lea.hbm %s1243_s1, %s600_s15  ;;  %s1101_s10 = int_to_ptr.vmem [resolvable:$true] %s224_s10 }
  0x55   : > { %s231_s29 = sand.u32 1, %s920_s21   ;;  %s214_s17 = scalar_lea.sflag [#allocation3], %s213_s30 }
  0x56   : > { %s782_s16 = scalar_lea.hbm %s1098_s8, 128  ;;  %p784_p0 = pneg %p1103_p11 }
  0x57   : > { %p783_p12 = scmp.ne.s32.totalorder %s1098_s8, %s782_s16  ;;  %s787_s2 = scalar_lea.hbm %s1242_s0, 256 }
  0x58   : > { %p788_p13 = scmp.lt.u32.totalorder %s1098_s8, %s1242_s0  ;;  %p789_p6 = scmp.lt.u32.totalorder %s787_s2, %s782_s16 }
  0x59   : > { %p785_p2 = pnand %p784_p0, %p783_p12  ;;  %p791_p3 = scmp.lt.u32.totalorder %s782_s16, %s1098_s8 }
  0x5a   : > { %p790_p10 = por %p789_p6, %p788_p13 }
  0x5b   : > { %p786_p1 = pneg %p785_p2 }
  0x5c   : > { %p792_p7 = por %p791_p3, %p790_p10 }
  0x5e   : > { %p793_p9 = pnand %p792_p7, %p786_p1 }
  0x60   : > { %796 = shalt.err (!%p793_p9)
}
  0x61   : > { %s797_s30 = scalar_lea.vmem %s1101_s10, 128  ;;  %s926_s15 = smov [#allocation2]  }
  0x62   : > { %p798_p12 = scmp.ne.s32.totalorder %s1101_s10, %s797_s30  ;;  %s802_s12 = sshll.u32 %s926_s15, 4  ;;  %s803_s12 = int_to_ptr.vmem [resolvable:$false] %s802_s12 }
  0x63   : > { %s804_s3 = scalar_lea.vmem %s803_s12, 256  ;;  %p805_p4 = scmp.lt.s32.totalorder %s1101_s10, %s803_s12 }
  0x64   : > { %p800_p2 = pnand %p798_p12, %p784_p0  ;;  %p806_p13 = scmp.lt.s32.totalorder %s804_s3, %s797_s30 }
  0x66   : > { %p801_p5 = pneg %p800_p2  ;;  %p807_p6 = por %p806_p13, %p805_p4 }
  0x68   : > { %p808_p10 = pnand %p807_p6, %p801_p5 }
  0x6a   : > { %811 = shalt.err (!%p808_p10)
}
  0x6b   : > { %663 = dma.hbm_to_vmem [thread:$0]  (!%p1103_p11), %s1098_s8, 128, %s1101_s10, %s214_s17  }
  0x6c   : > { %s235_s2 = scalar_lea.vmem [#allocation5], %s1092_s6  ;;  %s232_s7 = scalar_lea.sflag [#allocation6], %s231_s29 }
  0x6d   : > { %s242_s16 = sshll.u32 %s235_s2, 4  ;;  %s812_s9 = scalar_lea.hbm %s1110_s13, 128  ;;  %s243_s16 = int_to_ptr.vmem [resolvable:$true] %s242_s16 }
  0x6e   : > { %p813_p4 = scmp.ne.s32.totalorder %s1110_s13, %s812_s9  ;;  %s817_s15 = scalar_lea.hbm %s1243_s1, 256 }
  0x6f   : > { %p818_p3 = scmp.lt.u32.totalorder %s1110_s13, %s1243_s1  ;;  %p819_p7 = scmp.lt.u32.totalorder %s817_s15, %s812_s9 }
  0x70   : > { %p815_p5 = pnand %p813_p4, %p784_p0  ;;  %p821_p12 = scmp.lt.u32.totalorder %s812_s9, %s1110_s13 }
  0x71   : > { %p820_p9 = por %p819_p7, %p818_p3 }
  0x72   : > { %p816_p1 = pneg %p815_p5 }
  0x73   : > { %p822_p2 = por %p821_p12, %p820_p9 }
  0x75   : > { %p823_p13 = pnand %p822_p2, %p816_p1 }
  0x77   : > { %826 = shalt.err (!%p823_p13)
}
  0x78   : > { %s827_s6 = scalar_lea.vmem %s243_s16, 128  ;;  %s927_s8 = smov [#allocation5]  }
  0x79   : > { %p828_p6 = scmp.ne.s32.totalorder %s243_s16, %s827_s6  ;;  %s832_s10 = sshll.u32 %s927_s8, 4  ;;  %s833_s10 = int_to_ptr.vmem [resolvable:$false] %s832_s10 }
  0x7a   : > { %s834_s29 = scalar_lea.vmem %s833_s10, 256  ;;  %p835_p5 = scmp.lt.s32.totalorder %s243_s16, %s833_s10 }
  0x7b   : > { %p830_p10 = pnand %p828_p6, %p784_p0  ;;  %p836_p8 = scmp.lt.s32.totalorder %s834_s29, %s827_s6 }
  0x7d   : > { %p831_p4 = pneg %p830_p10  ;;  %p837_p3 = por %p836_p8, %p835_p5 }
  0x7f   : > { %p838_p7 = pnand %p837_p3, %p831_p4 }
  0x81   : > { %841 = shalt.err (!%p838_p7)
}
  0x82   : > { %666 = dma.hbm_to_vmem [thread:$0]  (!%p1103_p11), %s1110_s13, 128, %s243_s16, %s232_s7  }
  0x83   : > { %p1263_p1 = scmp.ne.s32.totalorder %s1256_s26, 0 }
  0x84   : > { %s1163_s17 = sand.u32 (!%p1263_p1), 1, %s912_s19   ;;  %p1264_p8 = scmp.ne.s32.totalorder (!%p1263_p1), %s1254_s24, 0 }
  0x85   : > { %251 = sbr.rel (%p1263_p1) target bundleno = 1102 (0x44e), region = 40  ;;  %s1166_s2 = sshll.u32 (!%p1263_p1), %s1163_s17, 3 }
  0x86   : > { %s254_s9 = scalar_lea.sflag (!%p1263_p1), [#allocation3], %s1163_s17  ;;  %s257_s28 = scalar_lea.vmem (!%p1263_p1), [#allocation2], %s1166_s2 }
  0x8c   : > { %887 = dma.done.wait (%p1264_p8), %s254_s9, 128  }
  0x8d   : > { %889 = vsyncadd (%p1264_p8), %s254_s9, 4294967168  ;;  %s262_s26 = sand.u32 1, %s984_s22   ;;  %s266_s13 = scalar_lea.vmem [#allocation5], %s1166_s2 }
  0x8e   : > { %s263_s11 = scalar_lea.sflag [#allocation6], %s262_s26 }
  0x8f   : > { %891 = dma.done.wait (%p1264_p8), %s263_s11, 128  }
  0x90   : > { %893 = vsyncadd (%p1264_p8), %s263_s11, 4294967168  ;;  %p1265_p11 = scmp.eq.s32.totalorder %s984_s22, 0 }
  0x92   : > { %895 = dma.done.wait (%p1265_p11), [#allocation6], 128   ;;  %p1266_p0 = pmov %p1265_p11 }
  0x94   : > { %897 = vsyncadd (%p1266_p0), [#allocation6], 4294967168  ;;  %p1267_p9 = pmov %p1266_p0 }
  0x95   : > { %p1268_p12 = pmov %p1266_p0 }
  0x96   : > { %899 = dma.done.wait (%p1267_p9), [#allocation9], 256  }
  0x97   : > { %901 = vsyncadd (%p1268_p12), [#allocation9], 4294967040  ;;  %v928_v0 = vmov 0.0   ;;  %vm929_vm0 = vmmov 0   ;;  %v717_v1 = vld [vmem:[#allocation8] sm:$0xff]   ;;  %v718_v2 = vld [vmem:[#allocation7] sm:$0xff]  }
  0x98   : > { %625 = vmatprep.subr.bf16.mxu0 %v928_v0  ;;  %633 = vmatprep.subr.bf16.mxu1 %v928_v0  ;;  %v719_v3 = vld [vmem:[#allocation8 + $0x8] sm:$0xff]   ;;  %v307_v4 = vld [vmem:[%s257_s28] sm:$0xff]  ;;  %vm379_vm1 = vcmask 130048   ;;  %vm329_vm2 = vcmask 261120   ;;  %s930_s7 = smov 32   ;;  %s931_s30 = smov 64  }
  0x99   : > { %635 = vmatprep.mubr.msk.bf16.mxu1 %vm929_vm0, %v928_v0  ;;  %629 = vmatprep.mubr.msk.bf16.mxu0 %vm929_vm0, %v928_v0  ;;  %v308_v5 = vld [vmem:[%s266_s13] sm:$0xff]  ;;  %v309_v6 = vpack.c.bf16 %v307_v4, %v307_v4  ;;  %v614_v12 = vld [vmem:[%s1246_s4] ss:$0 sm:$0xff]  ;;  %s617_s15 = sshll.u32 %s984_s22, 7  ;;  %s305_s12 = scalar_lea.vmem [#allocation10], %s1166_s2 }
  0x9a   : > { %626 = vmatpush3.bf16.msra.mxu0 %v717_v1  ;;  %634 = vmatpush3.bf16.msra.mxu1 %v718_v2  ;;  %v312_v7 = vpack.c.bf16 %v308_v5, %v308_v5  ;;  %s482_s3 = sshll.u32 %s305_s12, 4  ;;  %s1197_s10 = scalar_lea.hbm %s1247_s5, %s617_s15  ;;  %s1199_s3 = int_to_ptr.vmem [resolvable:$true] %s482_s3 }
  0x9b   : > { %627 = vmatprep.subr.bf16.mxu0 %v928_v0  ;;  %s469_s29 = scalar_lea.sflag [#allocation4], %s1163_s17  ;;  %s842_s9 = scalar_lea.vmem %s1199_s3, 128 }
  0x9c   : > { %p843_p2 = scmp.ne.s32.totalorder %s1199_s3, %s842_s9  ;;  %p1269_p13 = scmp.ne.s32.totalorder %s1261_s23, 0 }
  0x9d   : > { %636 = vmatmul.mubr.msk.bf16.vlgmr.msra.gmra.mrb[0].mxu1 %vm379_vm1, %v309_v6  ;;  %s932_s22 = smov [#allocation10]  }
  0x9e   : > { %628 = vmatpush3.bf16.msra.mxu0 %v719_v3  ;;  %p844_p6 = pnand %p843_p2, %p1269_p13  ;;  %s846_s2 = sshll.u32 %s932_s22, 4  ;;  %s847_s2 = int_to_ptr.vmem [resolvable:$false] %s846_s2 }
  0x9f   : > { %s848_s28 = scalar_lea.vmem %s847_s2, 256  ;;  %p849_p4 = scmp.lt.s32.totalorder %s1199_s3, %s847_s2 }
  0xa0   : > { %p845_p10 = pneg %p844_p6  ;;  %p850_p5 = scmp.lt.s32.totalorder %s848_s28, %s842_s9 }
  0xa1   : > { %630 = vmatmul.mubr.msk.bf16.vlgmr.msra.gmra.mrb[0].mxu0 %vm329_vm2, %v312_v7 }
  0xa2   : > { %p851_p3 = por %p850_p5, %p849_p4 }
  0xa4   : > { %p852_p7 = pnand %p851_p3, %p845_p10 }
 0x170   : > { %v417_v8 = vpop.f32.mrb[0].mxu1 }
 0x171   : > { %v637_v9 = vpop.f32.mrb[1].mxu1 }
 0x172   : > { %v420_v10 = vpop.f32.mrb[2].mxu1 }
 0x173   : > { %v638_v13 = vpop.f32.mrb[3].mxu1 }
 0x174   : > { %v367_v11 = vpop.f32.mrb[0].mxu0 }
 0x175   : > { %v418_v14 = vadd.f32 %v417_v8, %v367_v11  ;;  %v631_v15 = vpop.f32.mrb[1].mxu0 }
 0x176   : > { %v370_v16 = vpop.f32.mrb[2].mxu0 }
 0x177   : > { %v430_v17 = vadd.f32 %v614_v12, %v418_v14  ;;  %v632_v18 = vpop.f32.mrb[3].mxu0 }
 0x179   : > { %438 = vrot.lane.b32.xlu0 %v430_v17, %s930_s7  ;;  %v615_v19 = vmul.f32 -1.442695, %v430_v17 }
 0x17b   : > { %720 = vpow2.f32 %v615_v19 }
 0x185   : > { %v721_v20 = vpop.eup %720 }
 0x186   : > { %v434_v21 = vadd.f32 1.0, %v721_v20 }
 0x188   : > { %722 = vrcp.f32 %v434_v21 }
 0x192   : > { %v723_v22 = vpop.eup %722 }
 0x1eb   : > { %v439_v23 = vpop.permute.xlu0 %438 }
 0x1ec   : > { %v441_v24 = vmul.f32 %v723_v22, %v439_v23 }
 0x1ee   : > { %443 = vrot.lane.b32.xlu0 %v441_v24, %s931_s30 }
 0x260   : > { %v444_v25 = vpop.permute.xlu0 %443 }
 0x261   : > { %v446_v26 = vadd.f32 %v444_v25, %v430_v17 }
 0x263   : > { %724 = vtanh.f32 %v446_v26 }
 0x26d   : > { %v725_v27 = vpop.eup %724 }
 0x26e   : > { %449 = vrot.lane.b32.xlu1 %v725_v27, %s931_s30 }
 0x2e0   : > { %v450_v28 = vpop.permute.xlu1 %449 }
 0x2e1   : > { %v452_v29 = vsub.f32 %v308_v5, %v450_v28 }
 0x2e3   : > { %454 = vrot.lane.b32.xlu1 %v452_v29, %s930_s7 }
 0x355   : > { %v455_v30 = vpop.permute.xlu1 %454 }
 0x356   : > { %v457_v31 = vmul.f32 %v723_v22, %v455_v30 }
 0x358   : > { %459 = vrot.lane.b32.xlu0 %v457_v31, %s930_s7 }
 0x3ca   : > { %v460_v32 = vpop.permute.xlu0 %459 }
 0x3cb   : > { %v462_v33 = vadd.f32 %v725_v27, %v460_v32 }
 0x3cd   : > { %464 = vrot.lane.b32.xlu1 %v462_v33, %s931_s30 }
 0x43f   : > { %v465_v34 = vpop.permute.xlu1 %464 }
 0x440   : > { %467 = vst.msk [vmem:[%s305_s12] sm:$0xff] %vm329_vm2, %v465_v34 }
 0x441   : > { %855 = shalt.err (!%p852_p7)
}
 0x442   : > { %s856_s17 = scalar_lea.hbm %s1197_s10, 128  ;;  %s860_s13 = scalar_lea.hbm %s1247_s5, 256 }
 0x443   : > { %p857_p1 = scmp.ne.s32.totalorder %s1197_s10, %s856_s17  ;;  %p861_p0 = scmp.lt.u32.totalorder %s1197_s10, %s1247_s5 }
 0x444   : > { %p862_p9 = scmp.lt.u32.totalorder %s860_s13, %s856_s17  ;;  %p864_p2 = scmp.lt.u32.totalorder %s856_s17, %s1197_s10 }
 0x445   : > { %p858_p8 = pnand %p857_p1, %p1269_p13 }
 0x446   : > { %p863_p12 = por %p862_p9, %p861_p0 }
 0x447   : > { %p859_p11 = pneg %p858_p8 }
 0x448   : > { %p865_p6 = por %p864_p2, %p863_p12 }
 0x44a   : > { %p866_p10 = pnand %p865_p6, %p859_p11 }
 0x44c   : > { %869 = shalt.err (!%p866_p10)
}
 0x44d   : > { %651 = dma.vmem_to_hbm [thread:$0]  (%p1269_p13), %s1199_s3, 128, %s1197_s10, %s469_s29  }
 0x44e PF: > { %s494_s7 = sand.u32 1, %s908_s18   ;;  %p1270_p4 = scmp.ne.s32.totalorder %s1255_s25, 0 }
 0x44f   : > { %p1271_p5 = scmp.ge.s32.totalorder %s920_s21, 2  ;;  %s495_s30 = scalar_lea.sflag [#allocation4], %s494_s7 }
 0x451   : > { %p668_p3 = pnand %p1271_p5, %p1270_p4 }
 0x453   : > { %903 = dma.done.wait (!%p668_p3), %s495_s30, 128  }
 0x454   : > { %905 = vsyncadd (!%p668_p3), %s495_s30, 4294967168  ;;  %p22_p7 = scmp.ge.s32.totalorder %s1073_s14, 4   ;;  %s1272_s18 = smov %s912_s19 }
 0x455   : > { %s1273_s19 = smov %s916_s20  ;;  %s1274_s20 = smov %s1089_s27 }
 0x456   : > { %s1275_s21 = smov %s1073_s14  ;;  %24 = sbr.rel (!%p22_p7) target bundleno = 11 (0xb), region = 106 }
 0x45d   :  { %500 = vsyncpa [#allocation3], 1 }
 0x45e   :  { %502 = vsyncpa [#allocation3 + $0x1], 1 }
 0x45f   :  { %503 = vsyncpa [#allocation6], 1 }
 0x460   :  { %505 = vsyncpa [#allocation6 + $0x1], 1 }
 0x461   :  { %506 = vsyncpa [#allocation9], 1 }
 0x462   :  { %507 = vsyncpa [#allocation4], 1 }
 0x463   :  { %509 = vsyncpa [#allocation4 + $0x1], 1 }

</bundles_post_ra>
